<compile_context>
chip_gen: v7x
topology: tpu7x:2x2x1
jax: 0.10.0
libtpu: 0.0.40
codegen_flags: <defaults>
</compile_context>

<pallas_src>
import jax
import jax.numpy as jnp
from jax.experimental import pallas as pl
from jax.experimental.pallas import tpu as pltpu


def _tail_kernel(x_ref, w1_ref, w2_ref, w3_ref, o_ref):
    # x_ref : (B, C, TM)            images x channels x pixels, pixels on lanes
    # w1_ref, w2_ref : (C, C)       PyTorch Conv2d layout (C_out, C_in), 1x1 squeezed
    # w3_ref : (NUM_CLASSES, C)
    # o_ref  : (B, NUM_CLASSES, TM)
    w1 = w1_ref[...].astype(jnp.float32)
    w2 = w2_ref[...].astype(jnp.float32)
    w3 = w3_ref[...].astype(jnp.float32)

    def mix(w, v):
        # (C_out, C_in) @ (C_in, TM) -> (C_out, TM)
        c_in = v.shape[0]
        if c_in >= 128:
            # Contraction deep enough to feed the MXU properly.
            return jnp.dot(w, v, preferred_element_type=jnp.float32)
        # Tiny channel count: unrolled broadcast multiply-adds on the VPU
        # (lane-dense, co-issues with relu/residual; avoids a 4-deep vmatmul).
        acc = w[:, 0:1] * v[0:1, :]
        for c in range(1, c_in):
            acc = acc + w[:, c:c + 1] * v[c:c + 1, :]
        return acc

    batch = x_ref.shape[0]            # static (block shape); capped small, so unroll
    for b in range(batch):
        x = x_ref[b].astype(jnp.float32)               # (C, TM)
        h = jnp.maximum(mix(w1, x), 0.0)               # relu(conv1(x))
        h = jnp.maximum(mix(w2, h), 0.0)               # relu(conv2(.))
        h = x + h                                      # residual add with input
        o_ref[b] = mix(w3, h).astype(o_ref.dtype)      # conv3


def _choose_pixel_tile(hw, target):
    """Return (tile_pix, padded_hw).  Prefer the full row (no padding) when it fits;
    otherwise the largest multiple-of-128 divisor of hw; otherwise pad hw up to a
    multiple of a 128-aligned tile."""
    if hw <= target:
        return hw, hw
    t = target - (target % 128)
    while t >= 128:
        if hw % t == 0:
            return t, hw
        t -= 128
    tile = target - (target % 128)
    padded = pl.cdiv(hw, tile) * tile
    return tile, padded


def _choose_batch_tile(n, per_image_bytes, budget_bytes=2 << 20, cap=8):
    """Largest divisor of n that keeps the per-step block under a VMEM budget and
    the unrolled in-kernel batch loop small."""
    max_by_mem = max(1, budget_bytes // max(per_image_bytes, 1))
    limit = max(1, min(cap, max_by_mem, n))
    best = 1
    for d in range(1, limit + 1):
        if n % d == 0:
            best = d
    return best


def conv_tail_net_pallas(x_nchw, w1, w2, w3, *, max_pixel_tile=2048):
    """x_nchw: (N, C, H, W).  Weights are in PyTorch Conv2d layout with the 1x1
    kernel squeezed: w1, w2: (C, C) = (C_out, C_in); w3: (num_classes, C)."""
    N, C, H, W = x_nchw.shape
    num_classes = w3.shape[0]
    assert w1.shape == (C, C) and w2.shape == (C, C) and w3.shape == (num_classes, C), \
        "weights must be (C_out, C_in) with the 1x1 spatial dims squeezed"

    HW = H * W
    tile_pix, padded_hw = _choose_pixel_tile(HW, max_pixel_tile)
    n_pix_tiles = padded_hw // tile_pix

    # Free reshape: NCHW is already channels x pixels with pixels contiguous.
    x_cm = x_nchw.reshape(N, C, HW)
    if padded_hw != HW:
        # Per-pixel math only -> padding is safe; padded pixels are sliced off below.
        x_cm = jnp.pad(x_cm, ((0, 0), (0, 0), (0, padded_hw - HW)))

    dtype_bytes = jnp.dtype(x_nchw.dtype).itemsize
    per_image_bytes = (C + num_classes) * tile_pix * dtype_bytes
    batch_tile = _choose_batch_tile(N, per_image_bytes)

    out = pl.pallas_call(
        _tail_kernel,
        out_shape=jax.ShapeDtypeStruct((N, num_classes, padded_hw), x_nchw.dtype),
        grid=(N // batch_tile, n_pix_tiles),
        in_specs=[
            pl.BlockSpec((batch_tile, C, tile_pix), lambda n, p: (n, 0, p)),   # x tile
            pl.BlockSpec((C, C), lambda n, p: (0, 0)),                         # w1 (resident)
            pl.BlockSpec((C, C), lambda n, p: (0, 0)),                         # w2 (resident)
            pl.BlockSpec((num_classes, C), lambda n, p: (0, 0)),               # w3 (resident)
        ],
        out_specs=pl.BlockSpec((batch_tile, num_classes, tile_pix),
                               lambda n, p: (n, 0, p)),
        compiler_params=pltpu.CompilerParams(
            dimension_semantics=("parallel", "parallel")),
    )(x_cm, w1, w2, w3)

    if padded_hw != HW:
        out = out[:, :, :HW]
    # Free reshape back to NCHW.
    return out.reshape(N, num_classes, H, W)


def _reference(x_nchw, w1, w2, w3):
    # Pure-JAX reference of the same math (for sanity check).
    N, C, H, W = x_nchw.shape
    xf = x_nchw.reshape(N, C, H * W).astype(jnp.float32)
    h = jnp.maximum(jnp.einsum('oc,ncm->nom', w1, xf), 0.0)
    h = jnp.maximum(jnp.einsum('oc,ncm->nom', w2, h), 0.0)
    h = xf + h
    o = jnp.einsum('oc,ncm->nom', w3, h)
    return o.reshape(N, -1, H, W).astype(x_nchw.dtype)


if __name__ == "__main__":
    key = jax.random.PRNGKey(0)
    N, C, H, W = 2, 4, 16, 16        # n_inputs = 4
    num_classes = 8

    kx, k1, k2, k3 = jax.random.split(key, 4)
    x = jax.random.normal(kx, (N, C, H, W), dtype=jnp.float32)

    # Deterministic weight init (roughly PyTorch kaiming_uniform bound for 1x1 conv).
    # PyTorch Conv2d weight is (C_out, C_in, 1, 1); we keep that layout (squeezed).
    bound = 1.0 / jnp.sqrt(jnp.float32(C))
    w1 = jax.random.uniform(k1, (C, C), jnp.float32, -bound, bound)
    w2 = jax.random.uniform(k2, (C, C), jnp.float32, -bound, bound)
    w3 = jax.random.uniform(k3, (num_classes, C), jnp.float32, -bound, bound)

    out = conv_tail_net_pallas(x, w1, w2, w3)
    out = jax.block_until_ready(out)

    ref = _reference(x, w1, w2, w3)
    assert out.shape == (N, num_classes, H, W)
    assert jnp.allclose(out, ref, atol=1e-5, rtol=1e-5)

    print("KERNEL_OK")
</pallas_src>

<mosaic_0001>
module attributes {stable_mosaic.version = 11 : i64} {
  func.func @_tail_kernel(%arg0: i32, %arg1: i32, %arg2: memref<2x4x256xf32, #tpu.memory_space<vmem>>, %arg3: memref<4x4xf32, #tpu.memory_space<vmem>>, %arg4: memref<4x4xf32, #tpu.memory_space<vmem>>, %arg5: memref<8x4xf32, #tpu.memory_space<vmem>>, %arg6: memref<2x8x256xf32, #tpu.memory_space<vmem>>) attributes {dimension_semantics = [#tpu.dimension_semantics<parallel>, #tpu.dimension_semantics<parallel>], iteration_bounds = array<i64: 1, 1>, scalar_prefetch = 0 : i64, scratch_operands = 0 : i64, tpu.core_type = #tpu.core_type<tc>, window_params = [{transform_indices = @transform_0, window_bounds = array<i64: 2, 4, 256>}, {pipeline_mode = #tpu.pipeline_mode<synchronous>, transform_indices = @transform_1, window_bounds = array<i64: 4, 4>}, {pipeline_mode = #tpu.pipeline_mode<synchronous>, transform_indices = @transform_2, window_bounds = array<i64: 4, 4>}, {pipeline_mode = #tpu.pipeline_mode<synchronous>, transform_indices = @transform_3, window_bounds = array<i64: 8, 4>}, {transform_indices = @transform_4, window_bounds = array<i64: 2, 8, 256>}]} {
    %c0 = arith.constant 0 : index
    %c0_0 = arith.constant 0 : index
    %0 = vector.load %arg3[%c0, %c0_0] : memref<4x4xf32, #tpu.memory_space<vmem>>, vector<4x4xf32>
    %c0_1 = arith.constant 0 : index
    %c0_2 = arith.constant 0 : index
    %1 = vector.load %arg4[%c0_1, %c0_2] : memref<4x4xf32, #tpu.memory_space<vmem>>, vector<4x4xf32>
    %c0_3 = arith.constant 0 : index
    %c0_4 = arith.constant 0 : index
    %2 = vector.load %arg5[%c0_3, %c0_4] : memref<8x4xf32, #tpu.memory_space<vmem>>, vector<8x4xf32>
    %c0_5 = arith.constant 0 : index
    %c0_6 = arith.constant 0 : index
    %c0_7 = arith.constant 0 : index
    %3 = vector.load %arg2[%c0_5, %c0_6, %c0_7] : memref<2x4x256xf32, #tpu.memory_space<vmem>>, vector<1x4x256xf32>
    %4 = vector.shape_cast %3 : vector<1x4x256xf32> to vector<4x256xf32>
    %5 = vector.extract_strided_slice %0 {offsets = [0, 0], sizes = [4, 1], strides = [1, 1]} : vector<4x4xf32> to vector<4x1xf32>
    %6 = vector.extract_strided_slice %4 {offsets = [0, 0], sizes = [1, 256], strides = [1, 1]} : vector<4x256xf32> to vector<1x256xf32>
    %7 = vector.broadcast %5 : vector<4x1xf32> to vector<4x256xf32>
    %8 = vector.broadcast %6 : vector<1x256xf32> to vector<4x256xf32>
    %9 = arith.mulf %7, %8 : vector<4x256xf32>
    %10 = vector.extract_strided_slice %0 {offsets = [0, 1], sizes = [4, 1], strides = [1, 1]} : vector<4x4xf32> to vector<4x1xf32>
    %11 = vector.extract_strided_slice %4 {offsets = [1, 0], sizes = [1, 256], strides = [1, 1]} : vector<4x256xf32> to vector<1x256xf32>
    %12 = vector.broadcast %10 : vector<4x1xf32> to vector<4x256xf32>
    %13 = vector.broadcast %11 : vector<1x256xf32> to vector<4x256xf32>
    %14 = arith.mulf %12, %13 : vector<4x256xf32>
    %15 = arith.addf %9, %14 : vector<4x256xf32>
    %16 = vector.extract_strided_slice %0 {offsets = [0, 2], sizes = [4, 1], strides = [1, 1]} : vector<4x4xf32> to vector<4x1xf32>
    %17 = vector.extract_strided_slice %4 {offsets = [2, 0], sizes = [1, 256], strides = [1, 1]} : vector<4x256xf32> to vector<1x256xf32>
    %18 = vector.broadcast %16 : vector<4x1xf32> to vector<4x256xf32>
    %19 = vector.broadcast %17 : vector<1x256xf32> to vector<4x256xf32>
    %20 = arith.mulf %18, %19 : vector<4x256xf32>
    %21 = arith.addf %15, %20 : vector<4x256xf32>
    %22 = vector.extract_strided_slice %0 {offsets = [0, 3], sizes = [4, 1], strides = [1, 1]} : vector<4x4xf32> to vector<4x1xf32>
    %23 = vector.extract_strided_slice %4 {offsets = [3, 0], sizes = [1, 256], strides = [1, 1]} : vector<4x256xf32> to vector<1x256xf32>
    %24 = vector.broadcast %22 : vector<4x1xf32> to vector<4x256xf32>
    %25 = vector.broadcast %23 : vector<1x256xf32> to vector<4x256xf32>
    %26 = arith.mulf %24, %25 : vector<4x256xf32>
    %27 = arith.addf %21, %26 : vector<4x256xf32>
    %cst = arith.constant 0.000000e+00 : f32
    %28 = vector.broadcast %cst : f32 to vector<4x256xf32>
    %29 = arith.maximumf %27, %28 : vector<4x256xf32>
    %30 = vector.extract_strided_slice %1 {offsets = [0, 0], sizes = [4, 1], strides = [1, 1]} : vector<4x4xf32> to vector<4x1xf32>
    %31 = vector.extract_strided_slice %29 {offsets = [0, 0], sizes = [1, 256], strides = [1, 1]} : vector<4x256xf32> to vector<1x256xf32>
    %32 = vector.broadcast %30 : vector<4x1xf32> to vector<4x256xf32>
    %33 = vector.broadcast %31 : vector<1x256xf32> to vector<4x256xf32>
    %34 = arith.mulf %32, %33 : vector<4x256xf32>
    %35 = vector.extract_strided_slice %1 {offsets = [0, 1], sizes = [4, 1], strides = [1, 1]} : vector<4x4xf32> to vector<4x1xf32>
    %36 = vector.extract_strided_slice %29 {offsets = [1, 0], sizes = [1, 256], strides = [1, 1]} : vector<4x256xf32> to vector<1x256xf32>
    %37 = vector.broadcast %35 : vector<4x1xf32> to vector<4x256xf32>
    %38 = vector.broadcast %36 : vector<1x256xf32> to vector<4x256xf32>
    %39 = arith.mulf %37, %38 : vector<4x256xf32>
    %40 = arith.addf %34, %39 : vector<4x256xf32>
    %41 = vector.extract_strided_slice %1 {offsets = [0, 2], sizes = [4, 1], strides = [1, 1]} : vector<4x4xf32> to vector<4x1xf32>
    %42 = vector.extract_strided_slice %29 {offsets = [2, 0], sizes = [1, 256], strides = [1, 1]} : vector<4x256xf32> to vector<1x256xf32>
    %43 = vector.broadcast %41 : vector<4x1xf32> to vector<4x256xf32>
    %44 = vector.broadcast %42 : vector<1x256xf32> to vector<4x256xf32>
    %45 = arith.mulf %43, %44 : vector<4x256xf32>
    %46 = arith.addf %40, %45 : vector<4x256xf32>
    %47 = vector.extract_strided_slice %1 {offsets = [0, 3], sizes = [4, 1], strides = [1, 1]} : vector<4x4xf32> to vector<4x1xf32>
    %48 = vector.extract_strided_slice %29 {offsets = [3, 0], sizes = [1, 256], strides = [1, 1]} : vector<4x256xf32> to vector<1x256xf32>
    %49 = vector.broadcast %47 : vector<4x1xf32> to vector<4x256xf32>
    %50 = vector.broadcast %48 : vector<1x256xf32> to vector<4x256xf32>
    %51 = arith.mulf %49, %50 : vector<4x256xf32>
    %52 = arith.addf %46, %51 : vector<4x256xf32>
    %cst_8 = arith.constant 0.000000e+00 : f32
    %53 = vector.broadcast %cst_8 : f32 to vector<4x256xf32>
    %54 = arith.maximumf %52, %53 : vector<4x256xf32>
    %55 = arith.addf %4, %54 : vector<4x256xf32>
    %56 = vector.extract_strided_slice %2 {offsets = [0, 0], sizes = [8, 1], strides = [1, 1]} : vector<8x4xf32> to vector<8x1xf32>
    %57 = vector.extract_strided_slice %55 {offsets = [0, 0], sizes = [1, 256], strides = [1, 1]} : vector<4x256xf32> to vector<1x256xf32>
    %58 = vector.broadcast %56 : vector<8x1xf32> to vector<8x256xf32>
    %59 = vector.broadcast %57 : vector<1x256xf32> to vector<8x256xf32>
    %60 = arith.mulf %58, %59 : vector<8x256xf32>
    %61 = vector.extract_strided_slice %2 {offsets = [0, 1], sizes = [8, 1], strides = [1, 1]} : vector<8x4xf32> to vector<8x1xf32>
    %62 = vector.extract_strided_slice %55 {offsets = [1, 0], sizes = [1, 256], strides = [1, 1]} : vector<4x256xf32> to vector<1x256xf32>
    %63 = vector.broadcast %61 : vector<8x1xf32> to vector<8x256xf32>
    %64 = vector.broadcast %62 : vector<1x256xf32> to vector<8x256xf32>
    %65 = arith.mulf %63, %64 : vector<8x256xf32>
    %66 = arith.addf %60, %65 : vector<8x256xf32>
    %67 = vector.extract_strided_slice %2 {offsets = [0, 2], sizes = [8, 1], strides = [1, 1]} : vector<8x4xf32> to vector<8x1xf32>
    %68 = vector.extract_strided_slice %55 {offsets = [2, 0], sizes = [1, 256], strides = [1, 1]} : vector<4x256xf32> to vector<1x256xf32>
    %69 = vector.broadcast %67 : vector<8x1xf32> to vector<8x256xf32>
    %70 = vector.broadcast %68 : vector<1x256xf32> to vector<8x256xf32>
    %71 = arith.mulf %69, %70 : vector<8x256xf32>
    %72 = arith.addf %66, %71 : vector<8x256xf32>
    %73 = vector.extract_strided_slice %2 {offsets = [0, 3], sizes = [8, 1], strides = [1, 1]} : vector<8x4xf32> to vector<8x1xf32>
    %74 = vector.extract_strided_slice %55 {offsets = [3, 0], sizes = [1, 256], strides = [1, 1]} : vector<4x256xf32> to vector<1x256xf32>
    %75 = vector.broadcast %73 : vector<8x1xf32> to vector<8x256xf32>
    %76 = vector.broadcast %74 : vector<1x256xf32> to vector<8x256xf32>
    %77 = arith.mulf %75, %76 : vector<8x256xf32>
    %78 = arith.addf %72, %77 : vector<8x256xf32>
    %c0_9 = arith.constant 0 : index
    %c0_10 = arith.constant 0 : index
    %c0_11 = arith.constant 0 : index
    %79 = vector.load %arg6[%c0_9, %c0_10, %c0_11] : memref<2x8x256xf32, #tpu.memory_space<vmem>>, vector<1x8x256xf32>
    %80 = vector.shape_cast %79 : vector<1x8x256xf32> to vector<8x256xf32>
    %81 = vector.shape_cast %78 : vector<8x256xf32> to vector<1x8x256xf32>
    tpu.vector_store %arg6[%c0_9, %c0_10, %c0_11], %81 {strides = array<i32>} : memref<2x8x256xf32, #tpu.memory_space<vmem>>, vector<1x8x256xf32>,
    %c1 = arith.constant 1 : index
    %c0_12 = arith.constant 0 : index
    %c0_13 = arith.constant 0 : index
    %82 = vector.load %arg2[%c1, %c0_12, %c0_13] : memref<2x4x256xf32, #tpu.memory_space<vmem>>, vector<1x4x256xf32>
    %83 = vector.shape_cast %82 : vector<1x4x256xf32> to vector<4x256xf32>
    %84 = vector.extract_strided_slice %0 {offsets = [0, 0], sizes = [4, 1], strides = [1, 1]} : vector<4x4xf32> to vector<4x1xf32>
    %85 = vector.extract_strided_slice %83 {offsets = [0, 0], sizes = [1, 256], strides = [1, 1]} : vector<4x256xf32> to vector<1x256xf32>
    %86 = vector.broadcast %84 : vector<4x1xf32> to vector<4x256xf32>
    %87 = vector.broadcast %85 : vector<1x256xf32> to vector<4x256xf32>
    %88 = arith.mulf %86, %87 : vector<4x256xf32>
    %89 = vector.extract_strided_slice %0 {offsets = [0, 1], sizes = [4, 1], strides = [1, 1]} : vector<4x4xf32> to vector<4x1xf32>
    %90 = vector.extract_strided_slice %83 {offsets = [1, 0], sizes = [1, 256], strides = [1, 1]} : vector<4x256xf32> to vector<1x256xf32>
    %91 = vector.broadcast %89 : vector<4x1xf32> to vector<4x256xf32>
    %92 = vector.broadcast %90 : vector<1x256xf32> to vector<4x256xf32>
    %93 = arith.mulf %91, %92 : vector<4x256xf32>
    %94 = arith.addf %88, %93 : vector<4x256xf32>
    %95 = vector.extract_strided_slice %0 {offsets = [0, 2], sizes = [4, 1], strides = [1, 1]} : vector<4x4xf32> to vector<4x1xf32>
    %96 = vector.extract_strided_slice %83 {offsets = [2, 0], sizes = [1, 256], strides = [1, 1]} : vector<4x256xf32> to vector<1x256xf32>
    %97 = vector.broadcast %95 : vector<4x1xf32> to vector<4x256xf32>
    %98 = vector.broadcast %96 : vector<1x256xf32> to vector<4x256xf32>
    %99 = arith.mulf %97, %98 : vector<4x256xf32>
    %100 = arith.addf %94, %99 : vector<4x256xf32>
    %101 = vector.extract_strided_slice %0 {offsets = [0, 3], sizes = [4, 1], strides = [1, 1]} : vector<4x4xf32> to vector<4x1xf32>
    %102 = vector.extract_strided_slice %83 {offsets = [3, 0], sizes = [1, 256], strides = [1, 1]} : vector<4x256xf32> to vector<1x256xf32>
    %103 = vector.broadcast %101 : vector<4x1xf32> to vector<4x256xf32>
    %104 = vector.broadcast %102 : vector<1x256xf32> to vector<4x256xf32>
    %105 = arith.mulf %103, %104 : vector<4x256xf32>
    %106 = arith.addf %100, %105 : vector<4x256xf32>
    %cst_14 = arith.constant 0.000000e+00 : f32
    %107 = vector.broadcast %cst_14 : f32 to vector<4x256xf32>
    %108 = arith.maximumf %106, %107 : vector<4x256xf32>
    %109 = vector.extract_strided_slice %1 {offsets = [0, 0], sizes = [4, 1], strides = [1, 1]} : vector<4x4xf32> to vector<4x1xf32>
    %110 = vector.extract_strided_slice %108 {offsets = [0, 0], sizes = [1, 256], strides = [1, 1]} : vector<4x256xf32> to vector<1x256xf32>
    %111 = vector.broadcast %109 : vector<4x1xf32> to vector<4x256xf32>
    %112 = vector.broadcast %110 : vector<1x256xf32> to vector<4x256xf32>
    %113 = arith.mulf %111, %112 : vector<4x256xf32>
    %114 = vector.extract_strided_slice %1 {offsets = [0, 1], sizes = [4, 1], strides = [1, 1]} : vector<4x4xf32> to vector<4x1xf32>
    %115 = vector.extract_strided_slice %108 {offsets = [1, 0], sizes = [1, 256], strides = [1, 1]} : vector<4x256xf32> to vector<1x256xf32>
    %116 = vector.broadcast %114 : vector<4x1xf32> to vector<4x256xf32>
    %117 = vector.broadcast %115 : vector<1x256xf32> to vector<4x256xf32>
    %118 = arith.mulf %116, %117 : vector<4x256xf32>
    %119 = arith.addf %113, %118 : vector<4x256xf32>
    %120 = vector.extract_strided_slice %1 {offsets = [0, 2], sizes = [4, 1], strides = [1, 1]} : vector<4x4xf32> to vector<4x1xf32>
    %121 = vector.extract_strided_slice %108 {offsets = [2, 0], sizes = [1, 256], strides = [1, 1]} : vector<4x256xf32> to vector<1x256xf32>
    %122 = vector.broadcast %120 : vector<4x1xf32> to vector<4x256xf32>
    %123 = vector.broadcast %121 : vector<1x256xf32> to vector<4x256xf32>
    %124 = arith.mulf %122, %123 : vector<4x256xf32>
    %125 = arith.addf %119, %124 : vector<4x256xf32>
    %126 = vector.extract_strided_slice %1 {offsets = [0, 3], sizes = [4, 1], strides = [1, 1]} : vector<4x4xf32> to vector<4x1xf32>
    %127 = vector.extract_strided_slice %108 {offsets = [3, 0], sizes = [1, 256], strides = [1, 1]} : vector<4x256xf32> to vector<1x256xf32>
    %128 = vector.broadcast %126 : vector<4x1xf32> to vector<4x256xf32>
    %129 = vector.broadcast %127 : vector<1x256xf32> to vector<4x256xf32>
    %130 = arith.mulf %128, %129 : vector<4x256xf32>
    %131 = arith.addf %125, %130 : vector<4x256xf32>
    %cst_15 = arith.constant 0.000000e+00 : f32
    %132 = vector.broadcast %cst_15 : f32 to vector<4x256xf32>
    %133 = arith.maximumf %131, %132 : vector<4x256xf32>
    %134 = arith.addf %83, %133 : vector<4x256xf32>
    %135 = vector.extract_strided_slice %2 {offsets = [0, 0], sizes = [8, 1], strides = [1, 1]} : vector<8x4xf32> to vector<8x1xf32>
    %136 = vector.extract_strided_slice %134 {offsets = [0, 0], sizes = [1, 256], strides = [1, 1]} : vector<4x256xf32> to vector<1x256xf32>
    %137 = vector.broadcast %135 : vector<8x1xf32> to vector<8x256xf32>
    %138 = vector.broadcast %136 : vector<1x256xf32> to vector<8x256xf32>
    %139 = arith.mulf %137, %138 : vector<8x256xf32>
    %140 = vector.extract_strided_slice %2 {offsets = [0, 1], sizes = [8, 1], strides = [1, 1]} : vector<8x4xf32> to vector<8x1xf32>
    %141 = vector.extract_strided_slice %134 {offsets = [1, 0], sizes = [1, 256], strides = [1, 1]} : vector<4x256xf32> to vector<1x256xf32>
    %142 = vector.broadcast %140 : vector<8x1xf32> to vector<8x256xf32>
    %143 = vector.broadcast %141 : vector<1x256xf32> to vector<8x256xf32>
    %144 = arith.mulf %142, %143 : vector<8x256xf32>
    %145 = arith.addf %139, %144 : vector<8x256xf32>
    %146 = vector.extract_strided_slice %2 {offsets = [0, 2], sizes = [8, 1], strides = [1, 1]} : vector<8x4xf32> to vector<8x1xf32>
    %147 = vector.extract_strided_slice %134 {offsets = [2, 0], sizes = [1, 256], strides = [1, 1]} : vector<4x256xf32> to vector<1x256xf32>
    %148 = vector.broadcast %146 : vector<8x1xf32> to vector<8x256xf32>
    %149 = vector.broadcast %147 : vector<1x256xf32> to vector<8x256xf32>
    %150 = arith.mulf %148, %149 : vector<8x256xf32>
    %151 = arith.addf %145, %150 : vector<8x256xf32>
    %152 = vector.extract_strided_slice %2 {offsets = [0, 3], sizes = [8, 1], strides = [1, 1]} : vector<8x4xf32> to vector<8x1xf32>
    %153 = vector.extract_strided_slice %134 {offsets = [3, 0], sizes = [1, 256], strides = [1, 1]} : vector<4x256xf32> to vector<1x256xf32>
    %154 = vector.broadcast %152 : vector<8x1xf32> to vector<8x256xf32>
    %155 = vector.broadcast %153 : vector<1x256xf32> to vector<8x256xf32>
    %156 = arith.mulf %154, %155 : vector<8x256xf32>
    %157 = arith.addf %151, %156 : vector<8x256xf32>
    %c1_16 = arith.constant 1 : index
    %c0_17 = arith.constant 0 : index
    %c0_18 = arith.constant 0 : index
    %158 = vector.load %arg6[%c1_16, %c0_17, %c0_18] : memref<2x8x256xf32, #tpu.memory_space<vmem>>, vector<1x8x256xf32>
    %159 = vector.shape_cast %158 : vector<1x8x256xf32> to vector<8x256xf32>
    %160 = vector.shape_cast %157 : vector<8x256xf32> to vector<1x8x256xf32>
    tpu.vector_store %arg6[%c1_16, %c0_17, %c0_18], %160 {strides = array<i32>} : memref<2x8x256xf32, #tpu.memory_space<vmem>>, vector<1x8x256xf32>,
    return
  }
  func.func @transform_0(%arg0: i32, %arg1: i32) -> (i32, i32, i32) {
    %c0_i32 = arith.constant 0 : i32
    %c0_i32_0 = arith.constant 0 : i32
    return %arg0, %c0_i32, %arg1 : i32, i32, i32
  }
  func.func @transform_1(%arg0: i32, %arg1: i32) -> (i32, i32) {
    %c0_i32 = arith.constant 0 : i32
    %c0_i32_0 = arith.constant 0 : i32
    %c0_i32_1 = arith.constant 0 : i32
    return %c0_i32, %c0_i32_0 : i32, i32
  }
  func.func @transform_2(%arg0: i32, %arg1: i32) -> (i32, i32) {
    %c0_i32 = arith.constant 0 : i32
    %c0_i32_0 = arith.constant 0 : i32
    %c0_i32_1 = arith.constant 0 : i32
    return %c0_i32, %c0_i32_0 : i32, i32
  }
  func.func @transform_3(%arg0: i32, %arg1: i32) -> (i32, i32) {
    %c0_i32 = arith.constant 0 : i32
    %c0_i32_0 = arith.constant 0 : i32
    %c0_i32_1 = arith.constant 0 : i32
    return %c0_i32, %c0_i32_0 : i32, i32
  }
  func.func @transform_4(%arg0: i32, %arg1: i32) -> (i32, i32, i32) {
    %c0_i32 = arith.constant 0 : i32
    %c0_i32_0 = arith.constant 0 : i32
    return %arg0, %c0_i32, %arg1 : i32, i32, i32
  }
}

</mosaic_0001>

<bundles_post_ra>
// kernel: tpu_custom_call.1
= control target key start
LH: loop header
LB: loop body
LE: loop exit
PB: predicated region body
PF: predicated region fallthrough
CT: control target
= control target key end

     0   :  { %9 = vsyncpa [#allocation3], 0  ;;  %s825_s0 = inlined_call_operand.hbm [shape: f32[2,4,256], index: 0, kind: input, shape index: {}]   ;;  %s826_s1 = inlined_call_operand.vmem [shape: f32[4,4], index: 1, kind: input, shape index: {}]   ;;  %s827_s2 = inlined_call_operand.vmem [shape: f32[4,4], index: 2, kind: input, shape index: {}]   ;;  %s828_s3 = inlined_call_operand.vmem [shape: f32[8,4], index: 3, kind: input, shape index: {}]   ;;  %s829_s4 = inlined_call_operand.hbm [shape: f32[2,8,256], index: 4, kind: output, shape index: {}]  }
   0x1   :  { %10 = vsyncpa [#allocation4], 0  ;;  %s639_s15 = smov [#allocation2]   ;;  %s591_s19 = scalar_lea.hbm %s825_s0, 256 }
   0x2   :  { %s16_s16 = sshll.u32 %s639_s15, 4  ;;  %p592_p0 = scmp.ne.s32.totalorder %s825_s0, %s591_s19  ;;  %s17_s16 = int_to_ptr.vmem [resolvable:$true] %s16_s16 }
   0x3   :  { %p595_p1 = scmp.lt.u32.totalorder %s591_s19, %s825_s0 }
   0x5   :  { %p597_p2 = pnand %p595_p1, %p592_p0 }
   0x7   :  { %600 = shalt.err (!%p597_p2)
}
   0x8   :  { %s601_s24 = scalar_lea.vmem %s17_s16, 256  ;;  %p606_p4 = scmp.lt.s32.totalorder %s17_s16, %s17_s16 }
   0x9   :  { %p602_p3 = scmp.ne.s32.totalorder %s17_s16, %s601_s24  ;;  %p607_p5 = scmp.lt.s32.totalorder %s601_s24, %s601_s24 }
   0xb   :  { %p608_p6 = por %p607_p5, %p606_p4 }
   0xd   :  { %p609_p7 = pnand %p608_p6, %p602_p3 }
   0xf   :  { %612 = shalt.err (!%p609_p7)
}
  0x10   :  { %s640_s25 = smov 128   ;;  %s641_s26 = smov 8  }
  0x11   :  { %22 = dma.hbm_to_vmem [thread:$0]  %s825_s0, 256, %s17_s16, [#allocation3], %s640_s25, %s640_s25, %s641_s26  }
  0x12   :  { %635 = dma.done.wait [#allocation3], 256  }
  0x13   :  { %636 = vsyncadd [#allocation3], 4294967040  ;;  %v642_v0 = vmov 0   ;;  %v643_v1 = vmov 2   ;;  %v32_v2 = vld [vmem:[%s826_s1] sm:$0xf]  ;;  %v42_v7 = vlaneseq }
  0x14   :  { %579 = vset.pattern.permute.xlu0 %v642_v0  ;;  %581 = vset.pattern.permute.xlu1 %v643_v1  ;;  %v644_v3 = vmov 1   ;;  %v645_v4 = vmov 3   ;;  %v33_v5 = vld [vmem:[%s827_s2] sm:$0xf]  ;;  %v701_v12 = vld [vmem:[#allocation2 + $0x8] sm:$0xff]  ;;  %s646_s2 = smov [#allocation5]  }
  0x15   :  { %38 = vperm.xlu0 %579, %v32_v2   ;;  %89 = vperm.xlu1 %581, %v32_v2   ;;  %v34_v6 = vld [vmem:[%s828_s3] sm:$0xff]  ;;  %v43_v8 = vshrl.u32 %v42_v7, 7  ;;  %s557_s3 = sshll.u32 %s646_s2, 4  ;;  %s558_s3 = int_to_ptr.vmem [resolvable:$true] %s557_s3 }
  0x16   :  { %v699_v11 = vld [vmem:[#allocation2] sm:$0xff]  ;;  %s613_s7 = scalar_lea.vmem %s558_s3, 512  ;;  %p618_p9 = scmp.lt.s32.totalorder %s558_s3, %s558_s3 }
  0x17   :  { %v695_v9 = vsub.s32 0, %v43_v8  ;;  %v697_v10 = vsub.s32 4, %v43_v8  ;;  %v703_v13 = vsub.s32 2, %v43_v8  ;;  %v705_v14 = vsub.s32 6, %v43_v8  ;;  %p614_p8 = scmp.ne.s32.totalorder %s558_s3, %s613_s7  ;;  %p619_p10 = scmp.lt.s32.totalorder %s613_s7, %s613_s7 }
  0x18   :  { %v707_v15 = vsub.s32 1, %v43_v8  ;;  %v709_v16 = vsub.s32 5, %v43_v8  ;;  %v711_v17 = vsub.s32 3, %v43_v8  ;;  %v713_v18 = vsub.s32 7, %v43_v8 }
  0x19   :  { %580 = vset.pattern.permute.xlu0 %v644_v3  ;;  %582 = vset.pattern.permute.xlu1 %v645_v4  ;;  %v45_v19 = vrot.slane %v699_v11, %v695_v9  ;;  %v49_v20 = vrot.slane %v699_v11, %v697_v10  ;;  %v324_v21 = vrot.slane %v701_v12, %v695_v9  ;;  %p620_p11 = por %p619_p10, %p618_p9 }
  0x1a   :  { %63 = vperm.xlu0 %580, %v32_v2   ;;  %115 = vperm.xlu1 %582, %v32_v2   ;;  %v328_v22 = vrot.slane %v701_v12, %v697_v10  ;;  %v95_v23 = vrot.slane %v699_v11, %v703_v13  ;;  %v99_v24 = vrot.slane %v699_v11, %v705_v14 }
  0x1b   :  { %v366_v25 = vrot.slane %v701_v12, %v703_v13  ;;  %v370_v26 = vrot.slane %v701_v12, %v705_v14  ;;  %v69_v27 = vrot.slane %v699_v11, %v707_v15  ;;  %v73_v28 = vrot.slane %v699_v11, %v709_v16  ;;  %p621_p12 = pnand %p620_p11, %p614_p8 }
  0x1c   :  { %v344_v29 = vrot.slane %v701_v12, %v707_v15  ;;  %v348_v30 = vrot.slane %v701_v12, %v709_v16  ;;  %v121_v31 = vrot.slane %v699_v11, %v711_v17  ;;  %v125_v32 = vrot.slane %v699_v11, %v713_v18 }
  0x1d   :  { %v388_v33 = vrot.slane %v701_v12, %v711_v17  ;;  %v392_v34 = vrot.slane %v701_v12, %v713_v18  ;;  %v55_v35 = vrot.slane %v45_v19, %v695_v9  ;;  %v59_v36 = vrot.slane %v49_v20, %v695_v9 }
  0x1e   :  { %158 = vperm.xlu0 %580, %v33_v5   ;;  %583 = vset.pattern.permute.xlu1 %v642_v0  ;;  %v334_v37 = vrot.slane %v324_v21, %v695_v9  ;;  %v338_v38 = vrot.slane %v328_v22, %v695_v9  ;;  %v105_v41 = vrot.slane %v95_v23, %v703_v13 }
  0x1f   :  { %144 = vperm.xlu1 %583, %v33_v5   ;;  %v109_v42 = vrot.slane %v99_v24, %v703_v13  ;;  %v376_v43 = vrot.slane %v366_v25, %v703_v13  ;;  %v380_v44 = vrot.slane %v370_v26, %v703_v13  ;;  %v79_v45 = vrot.slane %v69_v27, %v707_v15 }
  0x20   :  { %v83_v46 = vrot.slane %v73_v28, %v707_v15  ;;  %v354_v47 = vrot.slane %v344_v29, %v707_v15  ;;  %v358_v48 = vrot.slane %v348_v30, %v707_v15  ;;  %v131_v49 = vrot.slane %v121_v31, %v711_v17 }
  0x21   :  { %v135_v50 = vrot.slane %v125_v32, %v711_v17  ;;  %v398_v51 = vrot.slane %v388_v33, %v711_v17  ;;  %v402_v52 = vrot.slane %v392_v34, %v711_v17 }
  0x22   :  { %585 = vset.pattern.permute.xlu0 %v645_v4 }
  0x23   :  { %584 = vset.pattern.permute.xlu1 %v643_v1  ;;  %190 = vperm.xlu0 %585, %v33_v5  }
  0x24   :  { %174 = vperm.xlu1 %584, %v33_v5  }
  0x27   :  { %588 = vset.pattern.permute.xlu0 %v643_v1 }
  0x28   :  { %586 = vset.pattern.permute.xlu1 %v642_v0  ;;  %265 = vperm.xlu0 %588, %v34_v6  }
  0x29   :  { %214 = vperm.xlu1 %586, %v34_v6  }
  0x2c   :  { %590 = vset.pattern.permute.xlu0 %v645_v4 }
  0x2d   :  { %587 = vset.pattern.permute.xlu1 %v644_v3 }
  0x2e   :  { %239 = vperm.xlu1 %587, %v34_v6  }
  0x32   :  { %589 = vset.pattern.permute.xlu1 %v645_v4 }
  0x33   :  { %291 = vperm.xlu1 %589, %v34_v6  }
  0x94   :  { %v39_v39 = vpop.permute.xlu0 %38  ;;  %v90_v40 = vpop.permute.xlu1 %89 }
  0x95   :  { %v60_v53 = vmul.f32 %v55_v35, %v39_v39  ;;  %v61_v54 = vmul.f32 %v59_v36, %v39_v39  ;;  %v339_v55 = vmul.f32 %v334_v37, %v39_v39  ;;  %v340_v56 = vmul.f32 %v338_v38, %v39_v39 }
  0x96   :  { %v110_v57 = vmul.f32 %v105_v41, %v90_v40  ;;  %v111_v58 = vmul.f32 %v109_v42, %v90_v40  ;;  %v381_v59 = vmul.f32 %v376_v43, %v90_v40  ;;  %v382_v60 = vmul.f32 %v380_v44, %v90_v40 }
  0x99   :  { %v64_v61 = vpop.permute.xlu0 %63  ;;  %v116_v62 = vpop.permute.xlu1 %115 }
  0x9a   :  { %v84_v63 = vmul.f32 %v79_v45, %v64_v61  ;;  %v85_v0 = vmul.f32 %v83_v46, %v64_v61  ;;  %v359_v1 = vmul.f32 %v354_v47, %v64_v61  ;;  %v360_v2 = vmul.f32 %v358_v48, %v64_v61 }
  0x9b   :  { %v136_v3 = vmul.f32 %v131_v49, %v116_v62  ;;  %v137_v4 = vmul.f32 %v135_v50, %v116_v62  ;;  %v403_v5 = vmul.f32 %v398_v51, %v116_v62  ;;  %v404_v6 = vmul.f32 %v402_v52, %v116_v62 }
  0x9c   :  { %v86_v7 = vadd.f32 %v84_v63, %v60_v53  ;;  %v87_v8 = vadd.f32 %v85_v0, %v61_v54  ;;  %v361_v19 = vadd.f32 %v359_v1, %v339_v55  ;;  %v362_v20 = vadd.f32 %v360_v2, %v340_v56 }
  0x9d   :  { %v159_v38 = vpop.permute.xlu0 %158 }
  0x9e   :  { %v112_v21 = vadd.f32 %v110_v57, %v86_v7  ;;  %v113_v22 = vadd.f32 %v111_v58, %v87_v8  ;;  %v383_v23 = vadd.f32 %v381_v59, %v361_v19  ;;  %v384_v24 = vadd.f32 %v382_v60, %v362_v20  ;;  %v145_v29 = vpop.permute.xlu1 %144 }
  0xa0   :  { %v138_v25 = vadd.f32 %v136_v3, %v112_v21  ;;  %v139_v26 = vadd.f32 %v137_v4, %v113_v22  ;;  %v405_v27 = vadd.f32 %v403_v5, %v383_v23  ;;  %v406_v28 = vadd.f32 %v404_v6, %v384_v24 }
  0xa2   :  { %v140_v30 = vmax.f32 %v138_v25, 0.0  ;;  %v141_v31 = vmax.f32 %v139_v26, 0.0  ;;  %v407_v32 = vmax.f32 %v405_v27, 0.0  ;;  %v408_v33 = vmax.f32 %v406_v28, 0.0  ;;  %v191_v0 = vpop.permute.xlu0 %190 }
  0xa3   :  { %v175_v51 = vpop.permute.xlu1 %174 }
  0xa4   :  { %v164_v34 = vrot.slane %v140_v30, %v707_v15  ;;  %v168_v35 = vrot.slane %v141_v31, %v707_v15  ;;  %v422_v36 = vrot.slane %v407_v32, %v707_v15  ;;  %v426_v37 = vrot.slane %v408_v33, %v707_v15 }
  0xa5   :  { %v150_v39 = vrot.slane %v140_v30, %v695_v9  ;;  %v154_v40 = vrot.slane %v141_v31, %v695_v9  ;;  %v412_v41 = vrot.slane %v407_v32, %v695_v9  ;;  %v416_v42 = vrot.slane %v408_v33, %v695_v9 }
  0xa6   :  { %v169_v43 = vmul.f32 %v164_v34, %v159_v38  ;;  %v170_v44 = vmul.f32 %v168_v35, %v159_v38  ;;  %v427_v45 = vmul.f32 %v422_v36, %v159_v38  ;;  %v428_v46 = vmul.f32 %v426_v37, %v159_v38 }
  0xa7   :  { %v155_v47 = vmul.f32 %v150_v39, %v145_v29  ;;  %v156_v48 = vmul.f32 %v154_v40, %v145_v29  ;;  %v417_v49 = vmul.f32 %v412_v41, %v145_v29  ;;  %v418_v50 = vmul.f32 %v416_v42, %v145_v29 }
  0xa8   :  { %v180_v52 = vrot.slane %v140_v30, %v703_v13  ;;  %v184_v53 = vrot.slane %v141_v31, %v703_v13  ;;  %v434_v54 = vrot.slane %v407_v32, %v703_v13  ;;  %v438_v55 = vrot.slane %v408_v33, %v703_v13  ;;  %v215_v34 = vpop.permute.xlu1 %214 }
  0xa9   :  { %v171_v56 = vadd.f32 %v169_v43, %v155_v47  ;;  %v172_v57 = vadd.f32 %v170_v44, %v156_v48  ;;  %v429_v58 = vadd.f32 %v427_v45, %v417_v49  ;;  %v430_v59 = vadd.f32 %v428_v46, %v418_v50 }
  0xaa   :  { %v185_v60 = vmul.f32 %v180_v52, %v175_v51  ;;  %v186_v61 = vmul.f32 %v184_v53, %v175_v51  ;;  %v439_v62 = vmul.f32 %v434_v54, %v175_v51  ;;  %v440_v63 = vmul.f32 %v438_v55, %v175_v51 }
  0xab   :  { %v196_v1 = vrot.slane %v140_v30, %v711_v17  ;;  %v200_v2 = vrot.slane %v141_v31, %v711_v17  ;;  %v446_v3 = vrot.slane %v407_v32, %v711_v17  ;;  %v450_v4 = vrot.slane %v408_v33, %v711_v17 }
  0xac   :  { %v187_v5 = vadd.f32 %v185_v60, %v171_v56  ;;  %v188_v6 = vadd.f32 %v186_v61, %v172_v57  ;;  %v441_v7 = vadd.f32 %v439_v62, %v429_v58  ;;  %v442_v8 = vadd.f32 %v440_v63, %v430_v59  ;;  %v266_v63 = vpop.permute.xlu0 %265 }
  0xad   :  { %v201_v19 = vmul.f32 %v196_v1, %v191_v0  ;;  %v202_v20 = vmul.f32 %v200_v2, %v191_v0  ;;  %v451_v21 = vmul.f32 %v446_v3, %v191_v0  ;;  %v452_v22 = vmul.f32 %v450_v4, %v191_v0  ;;  %v240_v46 = vpop.permute.xlu1 %239 }
  0xaf   :  { %v203_v23 = vadd.f32 %v201_v19, %v187_v5  ;;  %v204_v24 = vadd.f32 %v202_v20, %v188_v6  ;;  %v453_v25 = vadd.f32 %v451_v21, %v441_v7  ;;  %v454_v26 = vadd.f32 %v452_v22, %v442_v8 }
  0xb1   :  { %v205_v27 = vmax.f32 %v203_v23, 0.0  ;;  %v206_v28 = vmax.f32 %v204_v24, 0.0  ;;  %v455_v29 = vmax.f32 %v453_v25, 0.0  ;;  %v456_v30 = vmax.f32 %v454_v26, 0.0 }
  0xb2   :  { %v292_v0 = vpop.permute.xlu1 %291 }
  0xb3   :  { %v209_v31 = vcombine.low %v205_v27, %v206_v28  ;;  %v459_v32 = vcombine.low %v455_v29, %v456_v30 }
  0xb5   :  { %v211_v33 = vadd.f32 %v209_v31, %v699_v11  ;;  %v461_v35 = vadd.f32 %v459_v32, %v701_v12 }
  0xb7   :  { %v221_v36 = vrot.slane %v211_v33, %v695_v9  ;;  %v225_v37 = vrot.slane %v211_v33, %v697_v10  ;;  %v466_v38 = vrot.slane %v461_v35, %v695_v9  ;;  %v470_v39 = vrot.slane %v461_v35, %v697_v10 }
  0xb8   :  { %v245_v40 = vrot.slane %v211_v33, %v707_v15  ;;  %v249_v41 = vrot.slane %v211_v33, %v709_v16  ;;  %v486_v42 = vrot.slane %v461_v35, %v707_v15  ;;  %v490_v43 = vrot.slane %v461_v35, %v709_v16 }
  0xb9   :  { %v231_v11 = vrot.slane %v221_v36, %v695_v9  ;;  %v235_v12 = vrot.slane %v225_v37, %v695_v9  ;;  %v476_v44 = vrot.slane %v466_v38, %v695_v9  ;;  %v480_v45 = vrot.slane %v470_v39, %v695_v9 }
  0xba   :  { %v255_v47 = vrot.slane %v245_v40, %v707_v15  ;;  %v259_v10 = vrot.slane %v249_v41, %v707_v15  ;;  %v496_v48 = vrot.slane %v486_v42, %v707_v15  ;;  %v500_v49 = vrot.slane %v490_v43, %v707_v15 }
  0xbb   :  { %v236_v50 = vmul.f32 %v231_v11, %v215_v34  ;;  %v237_v51 = vmul.f32 %v235_v12, %v215_v34  ;;  %v297_v53 = vrot.slane %v211_v33, %v711_v17  ;;  %v301_v54 = vrot.slane %v211_v33, %v713_v18 }
  0xbc   :  { %v260_v16 = vmul.f32 %v255_v47, %v240_v46  ;;  %v261_v52 = vmul.f32 %v259_v10, %v240_v46  ;;  %v530_v55 = vrot.slane %v461_v35, %v711_v17  ;;  %v534_v9 = vrot.slane %v461_v35, %v713_v18 }
  0xbd   :  { %v481_v56 = vmul.f32 %v476_v44, %v215_v34  ;;  %v482_v57 = vmul.f32 %v480_v45, %v215_v34  ;;  %v271_v58 = vrot.slane %v211_v33, %v703_v13  ;;  %v275_v59 = vrot.slane %v211_v33, %v705_v14 }
  0xbe   :  { %v501_v60 = vmul.f32 %v496_v48, %v240_v46  ;;  %v502_v15 = vmul.f32 %v500_v49, %v240_v46  ;;  %v307_v61 = vrot.slane %v297_v53, %v711_v17  ;;  %v311_v62 = vrot.slane %v301_v54, %v711_v17 }
  0xbf   :  { %v262_v1 = vadd.f32 %v260_v16, %v236_v50  ;;  %v263_v2 = vadd.f32 %v261_v52, %v237_v51  ;;  %v281_v3 = vrot.slane %v271_v58, %v703_v13  ;;  %v285_v18 = vrot.slane %v275_v59, %v703_v13 }
  0xc0   :  { %v540_v4 = vrot.slane %v530_v55, %v711_v17  ;;  %v544_v5 = vrot.slane %v534_v9, %v711_v17  ;;  %v508_v6 = vrot.slane %v461_v35, %v703_v13  ;;  %v512_v7 = vrot.slane %v461_v35, %v705_v14 }
  0xc1   :  { %v286_v8 = vmul.f32 %v281_v3, %v266_v63  ;;  %v287_v19 = vmul.f32 %v285_v18, %v266_v63  ;;  %v312_v20 = vmul.f32 %v307_v61, %v292_v0  ;;  %v313_v21 = vmul.f32 %v311_v62, %v292_v0 }
  0xc2   :  { %v503_v22 = vadd.f32 %v501_v60, %v481_v56  ;;  %v504_v23 = vadd.f32 %v502_v15, %v482_v57  ;;  %v518_v24 = vrot.slane %v508_v6, %v703_v13  ;;  %v522_v25 = vrot.slane %v512_v7, %v703_v13 }
  0xc3   :  { %v288_v26 = vadd.f32 %v286_v8, %v262_v1  ;;  %v289_v27 = vadd.f32 %v287_v19, %v263_v2  ;;  %v545_v31 = vmul.f32 %v540_v4, %v292_v0  ;;  %v546_v14 = vmul.f32 %v544_v5, %v292_v0 }
  0xc4   :  { %v523_v30 = vmul.f32 %v518_v24, %v266_v63  ;;  %v524_v17 = vmul.f32 %v522_v25, %v266_v63 }
  0xc5   :  { %v314_v28 = vadd.f32 %v312_v20, %v288_v26  ;;  %v315_v29 = vadd.f32 %v313_v21, %v289_v27 }
  0xc6   :  { %v525_v32 = vadd.f32 %v523_v30, %v503_v22  ;;  %v526_v34 = vadd.f32 %v524_v17, %v504_v23 }
  0xc7   :  { %316 = vst [vmem:[#allocation5] sm:$0xff] %v314_v28  ;;  %317 = vst [vmem:[#allocation5 + $0x8] sm:$0xff] %v315_v29 }
  0xc8   :  { %v547_v33 = vadd.f32 %v545_v31, %v525_v32  ;;  %v548_v35 = vadd.f32 %v546_v14, %v526_v34 }
  0xca   :  { %550 = vst [vmem:[#allocation5 + $0x10] sm:$0xff] %v547_v33  ;;  %551 = vst [vmem:[#allocation5 + $0x18] sm:$0xff] %v548_v35 }
  0xcb   :  { %624 = shalt.err (!%p621_p12)
}
  0xcc   :  { %s625_s10 = scalar_lea.hbm %s829_s4, 512 }
  0xcd   :  { %p626_p13 = scmp.ne.s32.totalorder %s829_s4, %s625_s10  ;;  %p629_p0 = scmp.lt.u32.totalorder %s625_s10, %s829_s4 }
  0xcf   :  { %p631_p1 = pnand %p629_p0, %p626_p13 }
  0xd1   :  { %634 = shalt.err (!%p631_p1)
}
  0xd2   :  { %s647_s15 = smov 256   ;;  %s648_s16 = smov 16  }
  0xd3   :  { %563 = dma.vmem_to_hbm [thread:$0]  %s558_s3, 512, %s829_s4, [#allocation4], %s647_s15, %s647_s15, %s648_s16  }
  0xd4   :  { %637 = dma.done.wait [#allocation4], 512  }
  0xd5   :  { %638 = vsyncadd [#allocation4], 4294966784 }
  0xd6   :  { %567 = vsyncpa [#allocation3], 1 }
  0xd7   :  { %568 = vsyncpa [#allocation4], 1 }

</bundles_post_ra>
